<compile_context>
chip_gen: v5e
topology: v5e:2x2
jax: 0.10.0
libtpu: 0.0.40
codegen_flags: <defaults>
</compile_context>

<pallas_src>
import functools

import jax
import jax.numpy as jnp
from jax.experimental import pallas as pl
from jax.experimental.pallas import tpu as pltpu

_LANE = 128
# Per-buffer tile size target.  With double-buffered input + output the peak
# VMEM use is ~4x this, which stays under every generation's default scoped
# VMEM limit (16 MiB on v5e, 32 MiB on v6e/v7x) with plenty of headroom.
_TARGET_TILE_BYTES = 2 * 1024 * 1024


def _identity_kernel(x_ref, o_ref):
    # Pure copy of the current tile (HBM -> VMEM -> HBM, auto-pipelined).
    o_ref[...] = x_ref[...]


def _round_up(x, m):
    return ((x + m - 1) // m) * m


def _identity_impl(x):
    orig_shape = x.shape
    dtype = x.dtype

    total = 1
    for d in orig_shape:
        total *= d
    if total == 0:
        return x

    itemsize = jnp.dtype(dtype).itemsize
    # Sublane packing multiple: 8 for 4-byte, 16 for 2-byte, 32 for 1-byte.
    sublane = max(8, 32 // itemsize)
    # Largest dtype-aligned tile under the per-buffer byte budget.
    target_rows = max(
        sublane, (_TARGET_TILE_BYTES // (_LANE * itemsize)) // sublane * sublane
    )

    min_rows = -(-total // _LANE)  # cdiv(total, LANE)
    block_rows = min(target_rows, _round_up(min_rows, sublane))
    padded_rows = _round_up(min_rows, block_rows)
    padded_total = padded_rows * _LANE

    x_flat = jnp.reshape(x, (total,))
    needs_pad = padded_total != total
    if needs_pad:
        # Only the ragged remainder pays the pad/slice cost; aligned inputs
        # (the common NCHW case) take the zero-copy path.
        x_flat = jnp.pad(x_flat, (0, padded_total - total))
    x2d = jnp.reshape(x_flat, (padded_rows, _LANE))

    grid = (padded_rows // block_rows,)
    out2d = pl.pallas_call(
        _identity_kernel,
        out_shape=jax.ShapeDtypeStruct((padded_rows, _LANE), dtype),
        grid=grid,
        in_specs=[pl.BlockSpec((block_rows, _LANE), lambda i: (i, 0))],
        out_specs=pl.BlockSpec((block_rows, _LANE), lambda i: (i, 0)),
        compiler_params=pltpu.CompilerParams(
            dimension_semantics=("parallel",)
        ),
    )(x2d)

    if needs_pad:
        out_flat = jnp.reshape(out2d, (padded_total,))[:total]
    else:
        out_flat = jnp.reshape(out2d, (total,))
    return jnp.reshape(out_flat, orig_shape)


# jit so the (rare) pad/slice fuse with surrounding XLA ops; on the aligned
# path the whole thing lowers to reshape + a single Pallas copy.
identity_representation = jax.jit(_identity_impl)


if __name__ == "__main__":
    key = jax.random.PRNGKey(0)

    # NCHW input as the PyTorch module would see: batch=2, channels=4, 16x16.
    # 2*4*16*16 = 2048 elements -> already a multiple of 8*128 (no pad path).
    x = jax.random.normal(key, (2, 4, 16, 16), dtype=jnp.float32)
    y = identity_representation(x)
    y = jax.block_until_ready(y)
    assert y.shape == x.shape, (y.shape, x.shape)
    assert y.dtype == x.dtype, (y.dtype, x.dtype)
    assert bool(jnp.all(y == x)), "identity kernel output mismatch (f32 aligned)"

    # Ragged, sub-32-bit dtype exercise the padded path + 16-sublane alignment.
    x2 = jax.random.normal(key, (3, 5, 7), dtype=jnp.bfloat16)
    y2 = identity_representation(x2)
    y2 = jax.block_until_ready(y2)
    assert y2.shape == x2.shape, (y2.shape, x2.shape)
    assert y2.dtype == x2.dtype, (y2.dtype, x2.dtype)
    assert bool(jnp.all(y2 == x2)), "identity kernel output mismatch (bf16 ragged)"

    print("KERNEL_OK")
</pallas_src>

<mosaic_0001>
module attributes {stable_mosaic.version = 11 : i64} {
  func.func @_identity_kernel(%arg0: i32, %arg1: memref<16x128xf32, #tpu.memory_space<vmem>>, %arg2: memref<16x128xf32, #tpu.memory_space<vmem>>) attributes {dimension_semantics = [#tpu.dimension_semantics<parallel>], iteration_bounds = array<i64: 1>, scalar_prefetch = 0 : i64, scratch_operands = 0 : i64, tpu.core_type = #tpu.core_type<tc>, window_params = [{transform_indices = @transform_0, window_bounds = array<i64: 16, 128>}, {transform_indices = @transform_1, window_bounds = array<i64: 16, 128>}]} {
    %c0 = arith.constant 0 : index
    %c0_0 = arith.constant 0 : index
    %0 = vector.load %arg1[%c0, %c0_0] : memref<16x128xf32, #tpu.memory_space<vmem>>, vector<16x128xf32>
    %c0_1 = arith.constant 0 : index
    %c0_2 = arith.constant 0 : index
    %1 = vector.load %arg2[%c0_1, %c0_2] : memref<16x128xf32, #tpu.memory_space<vmem>>, vector<16x128xf32>
    tpu.vector_store %arg2[%c0_1, %c0_2], %0 {strides = array<i32>} : memref<16x128xf32, #tpu.memory_space<vmem>>, vector<16x128xf32>,
    return
  }
  func.func @transform_0(%arg0: i32) -> (i32, i32) {
    %c0_i32 = arith.constant 0 : i32
    %c0_i32_0 = arith.constant 0 : i32
    return %arg0, %c0_i32 : i32, i32
  }
  func.func @transform_1(%arg0: i32) -> (i32, i32) {
    %c0_i32 = arith.constant 0 : i32
    %c0_i32_0 = arith.constant 0 : i32
    return %arg0, %c0_i32 : i32, i32
  }
}

</mosaic_0001>

<bundles_post_ra>
// kernel: _identity_impl.1
= control target key start
LH: loop header
LB: loop body
LE: loop exit
PB: predicated region body
PF: predicated region fallthrough
CT: control target
= control target key end

     0   :  { %s38_s0 = inlined_call_operand.vmem [shape: f32[16,128], index: 0, kind: input, shape index: {}]   ;;  %s39_s1 = inlined_call_operand.vmem [shape: f32[16,128], index: 1, kind: output, shape index: {}]  }
   0x1   :  { %v8_v0 = vld [vmem:[%s38_s0] sm:$0xff]  ;;  %v9_v1 = vld [vmem:[%s38_s0 + $0x8] sm:$0xff] }
   0x2   :  { %10 = vst [vmem:[%s39_s1] sm:$0xff] %v8_v0 }
   0x3   :  { %11 = vst [vmem:[%s39_s1 + $0x8] sm:$0xff] %v9_v1 }

</bundles_post_ra>
